<compile_context>
chip_gen: v7x
topology: tpu7x:2x2x1
jax: 0.10.0
libtpu: 0.0.40
codegen_flags: <defaults>
</compile_context>

<pallas_src>
import numpy as np
import jax
import jax.numpy as jnp
from jax.experimental import pallas as pl
from jax.experimental.pallas import tpu as pltpu

HIDDEN = 25          # real hidden width (matches the PyTorch module)
SUB = 32             # lanes reserved per head inside a 128-lane group tile
HEADS_PER_GROUP = 128 // SUB   # 4 heads packed block-diagonally per group


def _round_up(x, m):
    return ((x + m - 1) // m) * m


def _critic_fused_kernel(sa_ref, w1_ref, b1_ref, w2_ref, b2_ref,
                         w3_ref, b3_ref, w4_ref, b4_ref, out_ref):
    """All critic heads, block-diagonally packed, in one kernel invocation.

    sa_ref : [tile_b, IN_P]      (state|action, zero-padded lanes)   f32
    w1_ref : [IN_P, NG*128]      bf16      b1_ref : [1, NG*128]      f32
    w2/w3  : [NG, 128, 128]      bf16      b2/b3  : [1, NG*128]      f32
    w4_ref : [NG, 128, OW]       bf16      b4_ref : [1, OW]          f32
    out_ref: [tile_b, OW]        f32  (lane-dense slab, sliced in wrapper)
    """
    ng = w2_ref.shape[0]
    sa = sa_ref[...].astype(jnp.bfloat16)

    # Layer 1 fused across all head-groups: one wide-N matmul.
    h1 = jnp.dot(sa, w1_ref[...], preferred_element_type=jnp.float32)
    h1 = jnp.maximum(h1 + b1_ref[...], 0.0)

    acc = jnp.zeros(out_ref.shape, jnp.float32)
    for g in range(ng):                       # NG is tiny (ceil(NH/4)); static unroll
        lo = g * 128
        h = h1[:, lo:lo + 128]
        h = jnp.maximum(
            jnp.dot(h.astype(jnp.bfloat16), w2_ref[g],
                    preferred_element_type=jnp.float32) + b2_ref[:, lo:lo + 128],
            0.0)
        h = jnp.maximum(
            jnp.dot(h.astype(jnp.bfloat16), w3_ref[g],
                    preferred_element_type=jnp.float32) + b3_ref[:, lo:lo + 128],
            0.0)
        acc = acc + jnp.dot(h.astype(jnp.bfloat16), w4_ref[g],
                            preferred_element_type=jnp.float32)
    out_ref[...] = acc + b4_ref[...]


def critic_forward_pallas(state, action, packed):
    """Single fused pallas_call for all heads; returns ([B_pad, OW] f32, B)."""
    w1, b1, w2, b2, w3, b3, w4, b4 = packed
    b, sd = state.shape
    ad = action.shape[1]
    in_p = w1.shape[0]
    ng = w2.shape[0]
    ow = w4.shape[2]

    # Batch tiling: single tile for small batches, 256-row tiles for big ones
    # (keeps v7x VMEM comfortable and gives >=2 parallel grid steps for b>256).
    tile_b = min(256, _round_up(max(b, 8), 8))
    b_pad = _round_up(b, tile_b)

    # Merge state|action into one zero-padded lane-dense input (no in-kernel concat).
    sa = jnp.zeros((b_pad, in_p), jnp.float32)
    sa = sa.at[:b, :sd].set(state.astype(jnp.float32))
    sa = sa.at[:b, sd:sd + ad].set(action.astype(jnp.float32))

    flops = 2 * b_pad * (in_p * ng * 128 + ng * (2 * 128 * 128 + 128 * ow))
    bytes_accessed = (4 * int(sa.size) + 4 * b_pad * ow
                      + sum(int(p.size) * p.dtype.itemsize for p in packed))

    vmem = pltpu.MemorySpace.VMEM
    out = pl.pallas_call(
        _critic_fused_kernel,
        out_shape=jax.ShapeDtypeStruct((b_pad, ow), jnp.float32),
        grid=(b_pad // tile_b,),
        in_specs=[pl.BlockSpec((tile_b, in_p), lambda i: (i, 0))]
                 + [pl.BlockSpec(memory_space=vmem)] * 8,   # weights resident in VMEM
        out_specs=pl.BlockSpec((tile_b, ow), lambda i: (i, 0)),
        compiler_params=pltpu.CompilerParams(
            dimension_semantics=("parallel",)),
        cost_estimate=pl.CostEstimate(
            flops=int(flops), transcendentals=0,
            bytes_accessed=int(bytes_accessed)),
    )(sa, w1, b1, w2, b2, w3, b3, w4, b4)
    return out, b


def _init_head(key, in_dim, out_dim):
    """PyTorch-Linear-style init (uniform +-1/sqrt(fan_in)), (in, out) layout."""
    dims = [(in_dim, HIDDEN), (HIDDEN, HIDDEN), (HIDDEN, HIDDEN), (HIDDEN, out_dim)]
    params = []
    for fi, fo in dims:
        key, kw, kb = jax.random.split(key, 3)
        bound = 1.0 / float(fi) ** 0.5
        w = jax.random.uniform(kw, (fi, fo), jnp.float32, -bound, bound)
        bb = jax.random.uniform(kb, (1, fo), jnp.float32, -bound, bound)
        params.extend([w, bb])
    return key, tuple(params)


class CriticPallas:
    """JAX/Pallas port of the PyTorch Critic: q1, q2 and all discrete heads fused."""

    def __init__(self, state_dim, action_dim, discrete_ranges, key):
        self.state_dim = state_dim
        self.action_dim = action_dim
        self.discrete_ranges = dict(discrete_ranges)
        self.head_names = list(self.discrete_ranges.keys())
        out_dims = [1, 1] + [self.discrete_ranges[n] for n in self.head_names]

        in_dim = state_dim + action_dim
        nh = len(out_dims)
        ng = -(-nh // HEADS_PER_GROUP)                 # groups of 4 heads
        in_p = _round_up(in_dim, 128)                  # lane-padded merged input
        ow = _round_up(max(sum(out_dims), 1), 128)     # lane-dense output slab width
        lane_off = np.cumsum([0] + out_dims[:-1])

        heads = []
        for od in out_dims:
            key, p = _init_head(key, in_dim, od)
            heads.append(p)
        self.head_params = heads        # unpadded (in,out)-layout; used by reference
        self.out_dims = out_dims
        self.lane_off = [int(o) for o in lane_off]

        # ---- Pack all heads block-diagonally ONCE at init (numpy, then device).
        w1 = np.zeros((in_p, ng * 128), np.float32)
        b1 = np.zeros((1, ng * 128), np.float32)
        w2 = np.zeros((ng, 128, 128), np.float32)
        b2 = np.zeros((1, ng * 128), np.float32)
        w3 = np.zeros((ng, 128, 128), np.float32)
        b3 = np.zeros((1, ng * 128), np.float32)
        w4 = np.zeros((ng, 128, ow), np.float32)
        b4 = np.zeros((1, ow), np.float32)
        for h, (pw1, pb1, pw2, pb2, pw3, pb3, pw4, pb4) in enumerate(heads):
            g, j = divmod(h, HEADS_PER_GROUP)
            base = g * 128 + j * SUB     # global lane offset of this head's hidden
            sub = j * SUB                # lane offset inside its group tile
            w1[:in_dim, base:base + HIDDEN] = np.asarray(pw1)
            b1[0, base:base + HIDDEN] = np.asarray(pb1)[0]
            w2[g, sub:sub + HIDDEN, sub:sub + HIDDEN] = np.asarray(pw2)
            b2[0, base:base + HIDDEN] = np.asarray(pb2)[0]
            w3[g, sub:sub + HIDDEN, sub:sub + HIDDEN] = np.asarray(pw3)
            b3[0, base:base + HIDDEN] = np.asarray(pb3)[0]
            off, d = self.lane_off[h], out_dims[h]
            w4[g, sub:sub + HIDDEN, off:off + d] = np.asarray(pw4)
            b4[0, off:off + d] = np.asarray(pb4)[0]

        # Weights in bf16 (matmul operands), biases stay f32 (VPU path).
        self.packed = (jnp.asarray(w1, jnp.bfloat16), jnp.asarray(b1),
                       jnp.asarray(w2, jnp.bfloat16), jnp.asarray(b2),
                       jnp.asarray(w3, jnp.bfloat16), jnp.asarray(b3),
                       jnp.asarray(w4, jnp.bfloat16), jnp.asarray(b4))

    def __call__(self, state, continuous_action):
        out, b = critic_forward_pallas(state, continuous_action, self.packed)
        q1 = out[:b, 0:1]
        q2 = out[:b, 1:2]
        discrete_q = {}
        for i, name in enumerate(self.head_names):
            off, d = self.lane_off[2 + i], self.out_dims[2 + i]
            discrete_q[name] = out[:b, off:off + d]
        return q1, q2, discrete_q


def _mlp4_ref(sa, params, matmul_dtype=jnp.float32):
    """Pure-JAX per-head reference. matmul_dtype=bf16 mirrors the kernel's
    mixed-precision math (bf16 operands, f32 accumulation / bias / ReLU)."""
    w1, b1, w2, b2, w3, b3, w4, b4 = params

    def mm(x, w):
        return jnp.dot(x.astype(matmul_dtype), w.astype(matmul_dtype),
                       preferred_element_type=jnp.float32)

    h = jnp.maximum(mm(sa, w1) + b1, 0.0)
    h = jnp.maximum(mm(h, w2) + b2, 0.0)
    h = jnp.maximum(mm(h, w3) + b3, 0.0)
    return mm(h, w4) + b4


if __name__ == "__main__":
    key = jax.random.PRNGKey(0)
    state_dim, action_dim = 8, 4
    batch = 2
    discrete_ranges = {"steer": 3, "gear": 5}

    key, k_model, k_state, k_action = jax.random.split(key, 4)
    critic = CriticPallas(state_dim, action_dim, discrete_ranges, k_model)

    state = jax.random.normal(k_state, (batch, state_dim), jnp.float32)
    action = jax.random.normal(k_action, (batch, action_dim), jnp.float32)

    q1, q2, dq = critic(state, action)
    jax.block_until_ready((q1, q2, dq))

    # Correctness check against pure-JAX references on the unpadded weights:
    #  - bf16-matched reference (same operand precision as the kernel): tight tol
    #  - full-f32 reference: loose sanity tol (bf16 approximation error only)
    sa = jnp.concatenate([state, action], axis=1)
    outs = [q1, q2] + [dq[name] for name in critic.head_names]
    exp_shapes = [(batch, 1), (batch, 1)] + \
                 [(batch, discrete_ranges[n]) for n in critic.head_names]
    for o, params, shp in zip(outs, critic.head_params, exp_shapes):
        assert o.shape == shp, (o.shape, shp)
        ref_bf = _mlp4_ref(sa, params, jnp.bfloat16)
        ref_f32 = _mlp4_ref(sa, params, jnp.float32)
        assert jnp.allclose(o, ref_bf, atol=2e-3), \
            float(jnp.max(jnp.abs(o - ref_bf)))
        assert jnp.allclose(o, ref_f32, atol=1e-1), \
            float(jnp.max(jnp.abs(o - ref_f32)))

    print("KERNEL_OK")
</pallas_src>

<mosaic_0001>
module attributes {stable_mosaic.version = 11 : i64} {
  func.func @_critic_fused_kernel(%arg0: i32, %arg1: memref<8x128xf32, #tpu.memory_space<vmem>>, %arg2: memref<128x128xbf16, #tpu.memory_space<vmem>>, %arg3: memref<1x128xf32, #tpu.memory_space<vmem>>, %arg4: memref<1x128x128xbf16, #tpu.memory_space<vmem>>, %arg5: memref<1x128xf32, #tpu.memory_space<vmem>>, %arg6: memref<1x128x128xbf16, #tpu.memory_space<vmem>>, %arg7: memref<1x128xf32, #tpu.memory_space<vmem>>, %arg8: memref<1x128x128xbf16, #tpu.memory_space<vmem>>, %arg9: memref<1x128xf32, #tpu.memory_space<vmem>>, %arg10: memref<8x128xf32, #tpu.memory_space<vmem>>) attributes {dimension_semantics = [#tpu.dimension_semantics<parallel>], iteration_bounds = array<i64: 1>, scalar_prefetch = 0 : i64, scratch_operands = 0 : i64, tpu.core_type = #tpu.core_type<tc>, window_params = [{transform_indices = @transform_0, window_bounds = array<i64: 8, 128>}, {pipeline_mode = #tpu.pipeline_mode<synchronous>, transform_indices = @transform_1, window_bounds = array<i64: 128, 128>}, {pipeline_mode = #tpu.pipeline_mode<synchronous>, transform_indices = @transform_2, window_bounds = array<i64: 1, 128>}, {pipeline_mode = #tpu.pipeline_mode<synchronous>, transform_indices = @transform_3, window_bounds = array<i64: 1, 128, 128>}, {pipeline_mode = #tpu.pipeline_mode<synchronous>, transform_indices = @transform_4, window_bounds = array<i64: 1, 128>}, {pipeline_mode = #tpu.pipeline_mode<synchronous>, transform_indices = @transform_5, window_bounds = array<i64: 1, 128, 128>}, {pipeline_mode = #tpu.pipeline_mode<synchronous>, transform_indices = @transform_6, window_bounds = array<i64: 1, 128>}, {pipeline_mode = #tpu.pipeline_mode<synchronous>, transform_indices = @transform_7, window_bounds = array<i64: 1, 128, 128>}, {pipeline_mode = #tpu.pipeline_mode<synchronous>, transform_indices = @transform_8, window_bounds = array<i64: 1, 128>}, {transform_indices = @transform_9, window_bounds = array<i64: 8, 128>}]} {
    %c0 = arith.constant 0 : index
    %c0_0 = arith.constant 0 : index
    %0 = vector.load %arg1[%c0, %c0_0] : memref<8x128xf32, #tpu.memory_space<vmem>>, vector<8x128xf32>
    %1 = arith.truncf %0 : vector<8x128xf32> to vector<8x128xbf16>
    %c0_1 = arith.constant 0 : index
    %c0_2 = arith.constant 0 : index
    %2 = vector.load %arg2[%c0_1, %c0_2] : memref<128x128xbf16, #tpu.memory_space<vmem>>, vector<128x128xbf16>
    %cst = arith.constant dense<0.000000e+00> : vector<8x128xf32>
    %3 = tpu.matmul %1, %2, %cst {dimension_numbers = #tpu.dot_dimension_numbers<[1], [0], [0], [1], [0, 0, 1, 1], [], []>} : vector<8x128xbf16>, vector<128x128xbf16>, vector<8x128xf32> -> vector<8x128xf32>
    %c0_3 = arith.constant 0 : index
    %c0_4 = arith.constant 0 : index
    %4 = vector.load %arg3[%c0_3, %c0_4] : memref<1x128xf32, #tpu.memory_space<vmem>>, vector<1x128xf32>
    %5 = vector.broadcast %4 : vector<1x128xf32> to vector<8x128xf32>
    %6 = arith.addf %3, %5 : vector<8x128xf32>
    %cst_5 = arith.constant 0.000000e+00 : f32
    %7 = vector.broadcast %cst_5 : f32 to vector<8x128xf32>
    %8 = arith.maximumf %6, %7 : vector<8x128xf32>
    %cst_6 = arith.constant 0.000000e+00 : f32
    %9 = vector.broadcast %cst_6 : f32 to vector<8x128xf32>
    %10 = arith.truncf %8 : vector<8x128xf32> to vector<8x128xbf16>
    %c0_7 = arith.constant 0 : index
    %c0_8 = arith.constant 0 : index
    %c0_9 = arith.constant 0 : index
    %11 = vector.load %arg4[%c0_7, %c0_8, %c0_9] : memref<1x128x128xbf16, #tpu.memory_space<vmem>>, vector<1x128x128xbf16>
    %12 = vector.shape_cast %11 : vector<1x128x128xbf16> to vector<128x128xbf16>
    %cst_10 = arith.constant dense<0.000000e+00> : vector<8x128xf32>
    %13 = tpu.matmul %10, %12, %cst_10 {dimension_numbers = #tpu.dot_dimension_numbers<[1], [0], [0], [1], [0, 0, 1, 1], [], []>} : vector<8x128xbf16>, vector<128x128xbf16>, vector<8x128xf32> -> vector<8x128xf32>
    %c0_11 = arith.constant 0 : index
    %c0_12 = arith.constant 0 : index
    %14 = vector.load %arg5[%c0_11, %c0_12] : memref<1x128xf32, #tpu.memory_space<vmem>>, vector<1x128xf32>
    %15 = vector.broadcast %14 : vector<1x128xf32> to vector<8x128xf32>
    %16 = arith.addf %13, %15 : vector<8x128xf32>
    %cst_13 = arith.constant 0.000000e+00 : f32
    %17 = vector.broadcast %cst_13 : f32 to vector<8x128xf32>
    %18 = arith.maximumf %16, %17 : vector<8x128xf32>
    %19 = arith.truncf %18 : vector<8x128xf32> to vector<8x128xbf16>
    %c0_14 = arith.constant 0 : index
    %c0_15 = arith.constant 0 : index
    %c0_16 = arith.constant 0 : index
    %20 = vector.load %arg6[%c0_14, %c0_15, %c0_16] : memref<1x128x128xbf16, #tpu.memory_space<vmem>>, vector<1x128x128xbf16>
    %21 = vector.shape_cast %20 : vector<1x128x128xbf16> to vector<128x128xbf16>
    %cst_17 = arith.constant dense<0.000000e+00> : vector<8x128xf32>
    %22 = tpu.matmul %19, %21, %cst_17 {dimension_numbers = #tpu.dot_dimension_numbers<[1], [0], [0], [1], [0, 0, 1, 1], [], []>} : vector<8x128xbf16>, vector<128x128xbf16>, vector<8x128xf32> -> vector<8x128xf32>
    %c0_18 = arith.constant 0 : index
    %c0_19 = arith.constant 0 : index
    %23 = vector.load %arg7[%c0_18, %c0_19] : memref<1x128xf32, #tpu.memory_space<vmem>>, vector<1x128xf32>
    %24 = vector.broadcast %23 : vector<1x128xf32> to vector<8x128xf32>
    %25 = arith.addf %22, %24 : vector<8x128xf32>
    %cst_20 = arith.constant 0.000000e+00 : f32
    %26 = vector.broadcast %cst_20 : f32 to vector<8x128xf32>
    %27 = arith.maximumf %25, %26 : vector<8x128xf32>
    %28 = arith.truncf %27 : vector<8x128xf32> to vector<8x128xbf16>
    %c0_21 = arith.constant 0 : index
    %c0_22 = arith.constant 0 : index
    %c0_23 = arith.constant 0 : index
    %29 = vector.load %arg8[%c0_21, %c0_22, %c0_23] : memref<1x128x128xbf16, #tpu.memory_space<vmem>>, vector<1x128x128xbf16>
    %30 = vector.shape_cast %29 : vector<1x128x128xbf16> to vector<128x128xbf16>
    %cst_24 = arith.constant dense<0.000000e+00> : vector<8x128xf32>
    %31 = tpu.matmul %28, %30, %cst_24 {dimension_numbers = #tpu.dot_dimension_numbers<[1], [0], [0], [1], [0, 0, 1, 1], [], []>} : vector<8x128xbf16>, vector<128x128xbf16>, vector<8x128xf32> -> vector<8x128xf32>
    %32 = arith.addf %9, %31 : vector<8x128xf32>
    %c0_25 = arith.constant 0 : index
    %c0_26 = arith.constant 0 : index
    %33 = vector.load %arg9[%c0_25, %c0_26] : memref<1x128xf32, #tpu.memory_space<vmem>>, vector<1x128xf32>
    %34 = vector.broadcast %33 : vector<1x128xf32> to vector<8x128xf32>
    %35 = arith.addf %32, %34 : vector<8x128xf32>
    %c0_27 = arith.constant 0 : index
    %c0_28 = arith.constant 0 : index
    %36 = vector.load %arg10[%c0_27, %c0_28] : memref<8x128xf32, #tpu.memory_space<vmem>>, vector<8x128xf32>
    tpu.vector_store %arg10[%c0_27, %c0_28], %35 {strides = array<i32>} : memref<8x128xf32, #tpu.memory_space<vmem>>, vector<8x128xf32>,
    return
  }
  func.func @transform_0(%arg0: i32) -> (i32, i32) {
    %c0_i32 = arith.constant 0 : i32
    %c0_i32_0 = arith.constant 0 : i32
    return %arg0, %c0_i32 : i32, i32
  }
  func.func @transform_1(%arg0: i32) -> (i32, i32) {
    %c0_i32 = arith.constant 0 : i32
    %c0_i32_0 = arith.constant 0 : i32
    %c0_i32_1 = arith.constant 0 : i32
    return %c0_i32, %c0_i32_0 : i32, i32
  }
  func.func @transform_2(%arg0: i32) -> (i32, i32) {
    %c0_i32 = arith.constant 0 : i32
    %c0_i32_0 = arith.constant 0 : i32
    %c0_i32_1 = arith.constant 0 : i32
    return %c0_i32, %c0_i32_0 : i32, i32
  }
  func.func @transform_3(%arg0: i32) -> (i32, i32, i32) {
    %c0_i32 = arith.constant 0 : i32
    %c0_i32_0 = arith.constant 0 : i32
    %c0_i32_1 = arith.constant 0 : i32
    %c0_i32_2 = arith.constant 0 : i32
    return %c0_i32, %c0_i32_0, %c0_i32_1 : i32, i32, i32
  }
  func.func @transform_4(%arg0: i32) -> (i32, i32) {
    %c0_i32 = arith.constant 0 : i32
    %c0_i32_0 = arith.constant 0 : i32
    %c0_i32_1 = arith.constant 0 : i32
    return %c0_i32, %c0_i32_0 : i32, i32
  }
  func.func @transform_5(%arg0: i32) -> (i32, i32, i32) {
    %c0_i32 = arith.constant 0 : i32
    %c0_i32_0 = arith.constant 0 : i32
    %c0_i32_1 = arith.constant 0 : i32
    %c0_i32_2 = arith.constant 0 : i32
    return %c0_i32, %c0_i32_0, %c0_i32_1 : i32, i32, i32
  }
  func.func @transform_6(%arg0: i32) -> (i32, i32) {
    %c0_i32 = arith.constant 0 : i32
    %c0_i32_0 = arith.constant 0 : i32
    %c0_i32_1 = arith.constant 0 : i32
    return %c0_i32, %c0_i32_0 : i32, i32
  }
  func.func @transform_7(%arg0: i32) -> (i32, i32, i32) {
    %c0_i32 = arith.constant 0 : i32
    %c0_i32_0 = arith.constant 0 : i32
    %c0_i32_1 = arith.constant 0 : i32
    %c0_i32_2 = arith.constant 0 : i32
    return %c0_i32, %c0_i32_0, %c0_i32_1 : i32, i32, i32
  }
  func.func @transform_8(%arg0: i32) -> (i32, i32) {
    %c0_i32 = arith.constant 0 : i32
    %c0_i32_0 = arith.constant 0 : i32
    %c0_i32_1 = arith.constant 0 : i32
    return %c0_i32, %c0_i32_0 : i32, i32
  }
  func.func @transform_9(%arg0: i32) -> (i32, i32) {
    %c0_i32 = arith.constant 0 : i32
    %c0_i32_0 = arith.constant 0 : i32
    return %arg0, %c0_i32 : i32, i32
  }
}

</mosaic_0001>

<bundles_post_ra>
// kernel: tpu_custom_call.1
= control target key start
LH: loop header
LB: loop body
LE: loop exit
PB: predicated region body
PF: predicated region fallthrough
CT: control target
= control target key end

     0   :  { %14 = vsyncpa [#allocation3], 0  ;;  %s1100_s0 = inlined_call_operand.hbm [shape: f32[8,128], index: 0, kind: input, shape index: {}]   ;;  %s1101_s1 = inlined_call_operand.hbm [shape: bf16[128,128], index: 1, kind: input, shape index: {}]   ;;  %s1102_s2 = inlined_call_operand.vmem [shape: f32[1,128], index: 2, kind: input, shape index: {}]   ;;  %s1103_s3 = inlined_call_operand.hbm [shape: bf16[1,128,128], index: 3, kind: input, shape index: {}]   ;;  %s1104_s4 = inlined_call_operand.vmem [shape: f32[1,128], index: 4, kind: input, shape index: {}]   ;;  %s1105_s5 = inlined_call_operand.hbm [shape: bf16[1,128,128], index: 5, kind: input, shape index: {}]   ;;  %s1106_s6 = inlined_call_operand.vmem [shape: f32[1,128], index: 6, kind: input, shape index: {}]   ;;  %s1107_s7 = inlined_call_operand.hbm [shape: bf16[1,128,128], index: 7, kind: input, shape index: {}]   ;;  %s1108_s8 = inlined_call_operand.vmem [shape: f32[1,128], index: 8, kind: input, shape index: {}]   ;;  %s1109_s9 = inlined_call_operand.hbm [shape: f32[8,128], index: 9, kind: output, shape index: {}]  }
   0x1   :  { %15 = vsyncpa [#allocation6], 0 }
   0x2   :  { %16 = vsyncpa [#allocation9], 0 }
   0x3   :  { %17 = vsyncpa [#allocation4], 0  ;;  %s904_s30 = smov [#allocation5]   ;;  %s764_s13 = scalar_lea.hbm %s1101_s1, 1024 }
   0x4   :  { %s33_s10 = sshll.u32 %s904_s30, 4  ;;  %p765_p0 = scmp.ne.s32.totalorder %s1101_s1, %s764_s13  ;;  %s34_s10 = int_to_ptr.vmem [resolvable:$true] %s33_s10 }
   0x5   :  { %p768_p1 = scmp.lt.u32.totalorder %s764_s13, %s1101_s1 }
   0x7   :  { %p770_p2 = pnand %p768_p1, %p765_p0 }
   0x9   :  { %773 = shalt.err (!%p770_p2)
}
   0xa   :  { %s774_s18 = scalar_lea.vmem %s34_s10, 1024  ;;  %p779_p4 = scmp.lt.s32.totalorder %s34_s10, %s34_s10 }
   0xb   :  { %p775_p3 = scmp.ne.s32.totalorder %s34_s10, %s774_s18  ;;  %p780_p5 = scmp.lt.s32.totalorder %s774_s18, %s774_s18 }
   0xd   :  { %p781_p6 = por %p780_p5, %p779_p4 }
   0xf   :  { %p782_p7 = pnand %p781_p6, %p775_p3 }
  0x11   :  { %785 = shalt.err (!%p782_p7)
}
  0x12   :  { %s905_s19 = smov 64   ;;  %s906_s20 = smov 4  }
  0x13   :  { %39 = dma.hbm_to_vmem [thread:$0]  %s1101_s1, 1024, %s34_s10, [#allocation6], %s905_s19, %s905_s19, %s906_s20  }
  0x14   :  { %s907_s23 = smov [#allocation8]   ;;  %s908_s25 = smov [#allocation2]  }
  0x15   :  { %s61_s24 = sshll.u32 %s907_s23, 4  ;;  %s24_s26 = sshll.u32 %s908_s25, 4  ;;  %s62_s24 = int_to_ptr.vmem [resolvable:$true] %s61_s24  ;;  %s25_s26 = int_to_ptr.vmem [resolvable:$true] %s24_s26 }
  0x16   :  { %s786_s29 = scalar_lea.hbm %s1105_s5, 1024 }
  0x17   :  { %p787_p8 = scmp.ne.s32.totalorder %s1105_s5, %s786_s29  ;;  %p790_p9 = scmp.lt.u32.totalorder %s786_s29, %s1105_s5 }
  0x19   :  { %p792_p10 = pnand %p790_p9, %p787_p8 }
  0x1b   :  { %795 = shalt.err (!%p792_p10)
}
  0x1c   :  { %s796_s1 = scalar_lea.vmem %s62_s24, 1024  ;;  %p801_p12 = scmp.lt.s32.totalorder %s62_s24, %s62_s24 }
  0x1d   :  { %p797_p11 = scmp.ne.s32.totalorder %s62_s24, %s796_s1  ;;  %p802_p13 = scmp.lt.s32.totalorder %s796_s1, %s796_s1 }
  0x1f   :  { %p803_p0 = por %p802_p13, %p801_p12 }
  0x21   :  { %p804_p1 = pnand %p803_p0, %p797_p11 }
  0x23   :  { %807 = shalt.err (!%p804_p1)
}
  0x24   :  { %67 = dma.hbm_to_vmem [thread:$0]  %s1105_s5, 1024, %s62_s24, [#allocation9], %s905_s19, %s905_s19, %s906_s20  }
  0x25   :  { %s808_s17 = scalar_lea.hbm %s1100_s0, 128 }
  0x26   :  { %p809_p2 = scmp.ne.s32.totalorder %s1100_s0, %s808_s17  ;;  %p812_p3 = scmp.lt.u32.totalorder %s808_s17, %s1100_s0 }
  0x28   :  { %p814_p4 = pnand %p812_p3, %p809_p2 }
  0x2a   :  { %817 = shalt.err (!%p814_p4)
}
  0x2b   :  { %s818_s25 = scalar_lea.vmem %s25_s26, 128  ;;  %p823_p6 = scmp.lt.s32.totalorder %s25_s26, %s25_s26 }
  0x2c   :  { %p819_p5 = scmp.ne.s32.totalorder %s25_s26, %s818_s25  ;;  %p824_p7 = scmp.lt.s32.totalorder %s818_s25, %s818_s25 }
  0x2e   :  { %p825_p8 = por %p824_p7, %p823_p6 }
  0x30   :  { %p826_p9 = pnand %p825_p8, %p819_p5 }
  0x32   :  { %829 = shalt.err (!%p826_p9)
}
  0x33   :  { %27 = dma.hbm_to_vmem [thread:$0]  %s1100_s0, 128, %s25_s26, [#allocation3]  }
  0x34   :  { %s909_s27 = smov [#allocation7]   ;;  %s910_s29 = smov [#allocation10]  }
  0x35   :  { %s47_s28 = sshll.u32 %s909_s27, 4  ;;  %s75_s30 = sshll.u32 %s910_s29, 4  ;;  %s48_s28 = int_to_ptr.vmem [resolvable:$true] %s47_s28  ;;  %s76_s30 = int_to_ptr.vmem [resolvable:$true] %s75_s30 }
  0x36   :  { %s830_s13 = scalar_lea.hbm %s1103_s3, 1024 }
  0x37   :  { %p831_p10 = scmp.ne.s32.totalorder %s1103_s3, %s830_s13  ;;  %p834_p11 = scmp.lt.u32.totalorder %s830_s13, %s1103_s3 }
  0x39   :  { %p836_p12 = pnand %p834_p11, %p831_p10 }
  0x3b   :  { %839 = shalt.err (!%p836_p12)
}
  0x3c   :  { %s840_s0 = scalar_lea.vmem %s48_s28, 1024  ;;  %p845_p0 = scmp.lt.s32.totalorder %s48_s28, %s48_s28 }
  0x3d   :  { %p841_p13 = scmp.ne.s32.totalorder %s48_s28, %s840_s0  ;;  %p846_p1 = scmp.lt.s32.totalorder %s840_s0, %s840_s0 }
  0x3f   :  { %p847_p2 = por %p846_p1, %p845_p0 }
  0x41   :  { %p848_p3 = pnand %p847_p2, %p841_p13 }
  0x43   :  { %851 = shalt.err (!%p848_p3)
}
  0x44   :  { %53 = dma.hbm_to_vmem [thread:$0]  %s1103_s3, 1024, %s48_s28, [#allocation6], %s905_s19, %s905_s19, %s906_s20  }
  0x45   :  { %s852_s21 = scalar_lea.hbm %s1107_s7, 1024 }
  0x46   :  { %p853_p4 = scmp.ne.s32.totalorder %s1107_s7, %s852_s21  ;;  %p856_p5 = scmp.lt.u32.totalorder %s852_s21, %s1107_s7 }
  0x48   :  { %p858_p6 = pnand %p856_p5, %p853_p4 }
  0x4a   :  { %861 = shalt.err (!%p858_p6)
}
  0x4b   :  { %s862_s24 = scalar_lea.vmem %s76_s30, 1024  ;;  %p867_p8 = scmp.lt.s32.totalorder %s76_s30, %s76_s30 }
  0x4c   :  { %p863_p7 = scmp.ne.s32.totalorder %s76_s30, %s862_s24  ;;  %p868_p9 = scmp.lt.s32.totalorder %s862_s24, %s862_s24 }
  0x4e   :  { %p869_p10 = por %p868_p9, %p867_p8 }
  0x50   :  { %p870_p11 = pnand %p869_p10, %p863_p7 }
  0x52   :  { %873 = shalt.err (!%p870_p11)
}
  0x53   :  { %81 = dma.hbm_to_vmem [thread:$0]  %s1107_s7, 1024, %s76_s30, [#allocation9], %s905_s19, %s905_s19, %s906_s20  }
  0x54   :  { %896 = dma.done.wait [#allocation3], 128  }
  0x55   :  { %897 = vsyncadd [#allocation3], 4294967168 }
  0x56   :  { %898 = dma.done.wait [#allocation6], 2048  }
  0x57   :  { %899 = vsyncadd [#allocation6], 4294965248 }
  0x58   :  { %900 = dma.done.wait [#allocation9], 2048  }
  0x59   :  { %901 = vsyncadd [#allocation9], 4294965248  ;;  %v911_v0 = vmov 0.0   ;;  %vm912_vm0 = vmmov 0   ;;  %v732_v1 = vld [vmem:[#allocation5] sm:$0xff]   ;;  %v733_v2 = vld [vmem:[#allocation5 + $0x8] sm:$0xff]  }
  0x5a   :  { %642 = vmatprep.subr.bf16.mxu0 %v911_v0  ;;  %658 = vmatprep.mubr.msk.bf16.mxu0 %vm912_vm0, %v911_v0  ;;  %v734_v3 = vld [vmem:[#allocation5 + $0x10] sm:$0xff]   ;;  %v740_v4 = vld [vmem:[#allocation7] sm:$0xff]   ;;  %v735_v5 = vld [vmem:[#allocation5 + $0x18] sm:$0xff]   ;;  %s913_s11 = smov [#allocation11]  }
  0x5b   :  { %662 = vmatprep.subr.bf16.mxu1 %v911_v0  ;;  %678 = vmatprep.mubr.msk.bf16.mxu1 %vm912_vm0, %v911_v0  ;;  %v741_v6 = vld [vmem:[#allocation7 + $0x8] sm:$0xff]   ;;  %v736_v7 = vld [vmem:[#allocation5 + $0x20] sm:$0xff]   ;;  %v742_v8 = vld [vmem:[#allocation7 + $0x10] sm:$0xff]   ;;  %s559_s12 = sshll.u32 %s913_s11, 4  ;;  %s560_s12 = int_to_ptr.vmem [resolvable:$true] %s559_s12 }
  0x5c   :  { %643 = vmatpush3.bf16.msra.mxu0 %v732_v1  ;;  %663 = vmatpush3.bf16.msra.mxu1 %v740_v4  ;;  %v737_v9 = vld [vmem:[#allocation5 + $0x28] sm:$0xff]   ;;  %v743_v10 = vld [vmem:[#allocation7 + $0x18] sm:$0xff]   ;;  %v738_v11 = vld [vmem:[#allocation5 + $0x30] sm:$0xff]   ;;  %p879_p13 = scmp.lt.s32.totalorder %s560_s12, %s560_s12 }
  0x5d   :  { %644 = vmatprep.subr.bf16.mxu0 %v911_v0  ;;  %664 = vmatprep.subr.bf16.mxu1 %v911_v0  ;;  %v744_v12 = vld [vmem:[#allocation7 + $0x20] sm:$0xff]   ;;  %v739_v13 = vld [vmem:[#allocation5 + $0x38] sm:$0xff]   ;;  %v745_v15 = vld [vmem:[#allocation7 + $0x28] sm:$0xff]  }
  0x5e   :  { %v100_v14 = vld [vmem:[#allocation2] sm:$0xff]  ;;  %v746_v17 = vld [vmem:[#allocation7 + $0x30] sm:$0xff]   ;;  %v748_v19 = vld [vmem:[#allocation8] sm:$0xff]  }
  0x5f   :  { %v101_v16 = vpack.c.bf16 %v100_v14, %v100_v14  ;;  %v747_v18 = vld [vmem:[#allocation7 + $0x38] sm:$0xff]   ;;  %v749_v20 = vld [vmem:[#allocation8 + $0x8] sm:$0xff]   ;;  %v750_v21 = vld [vmem:[#allocation8 + $0x10] sm:$0xff]  }
  0x60   :  { %645 = vmatpush3.bf16.msra.mxu0 %v733_v2  ;;  %665 = vmatpush3.bf16.msra.mxu1 %v741_v6  ;;  %v751_v22 = vld [vmem:[#allocation8 + $0x18] sm:$0xff]   ;;  %v752_v23 = vld [vmem:[#allocation8 + $0x20] sm:$0xff]   ;;  %v753_v24 = vld [vmem:[#allocation8 + $0x28] sm:$0xff]  }
  0x61   :  { %646 = vmatprep.subr.bf16.mxu0 %v911_v0  ;;  %666 = vmatprep.subr.bf16.mxu1 %v911_v0  ;;  %v570_v25 = vld [vmem:[%s1102_s2] ss:$0 sm:$0xff]  ;;  %v754_v33 = vld [vmem:[#allocation8 + $0x30] sm:$0xff]   ;;  %v756_v35 = vld [vmem:[#allocation10] sm:$0xff]  }
  0x62   :  { %v755_v34 = vld [vmem:[#allocation8 + $0x38] sm:$0xff]   ;;  %v757_v36 = vld [vmem:[#allocation10 + $0x8] sm:$0xff]   ;;  %v758_v37 = vld [vmem:[#allocation10 + $0x10] sm:$0xff]  }
  0x63   :  { %v759_v38 = vld [vmem:[#allocation10 + $0x18] sm:$0xff]   ;;  %v760_v39 = vld [vmem:[#allocation10 + $0x20] sm:$0xff]   ;;  %v761_v40 = vld [vmem:[#allocation10 + $0x28] sm:$0xff]  }
  0x64   :  { %647 = vmatpush3.bf16.msra.mxu0 %v734_v3  ;;  %667 = vmatpush3.bf16.msra.mxu1 %v742_v8  ;;  %v579_v41 = vld [vmem:[%s1104_s4] ss:$0 sm:$0xff]  ;;  %v762_v49 = vld [vmem:[#allocation10 + $0x30] sm:$0xff]  }
  0x65   :  { %648 = vmatprep.subr.bf16.mxu0 %v911_v0  ;;  %668 = vmatprep.subr.bf16.mxu1 %v911_v0  ;;  %v763_v50 = vld [vmem:[#allocation10 + $0x38] sm:$0xff]  }
  0x66   :  { %v588_v51 = vld [vmem:[%s1106_s6] ss:$0 sm:$0xff]  ;;  %s874_s6 = scalar_lea.vmem %s560_s12, 128 }
  0x67   :  { %v597_v59 = vld [vmem:[%s1108_s8] ss:$0 sm:$0xff]  ;;  %p875_p12 = scmp.ne.s32.totalorder %s560_s12, %s874_s6  ;;  %p880_p0 = scmp.lt.s32.totalorder %s874_s6, %s874_s6 }
  0x68   :  { %649 = vmatpush3.bf16.msra.mxu0 %v735_v5  ;;  %669 = vmatpush3.bf16.msra.mxu1 %v743_v10 }
  0x69   :  { %650 = vmatprep.subr.bf16.mxu0 %v911_v0  ;;  %670 = vmatprep.subr.bf16.mxu1 %v911_v0  ;;  %p881_p1 = por %p880_p0, %p879_p13 }
  0x6b   :  { %p882_p2 = pnand %p881_p1, %p875_p12 }
  0x6c   :  { %651 = vmatpush3.bf16.msra.mxu0 %v736_v7  ;;  %671 = vmatpush3.bf16.msra.mxu1 %v744_v12 }
  0x6d   :  { %652 = vmatprep.subr.bf16.mxu0 %v911_v0  ;;  %672 = vmatprep.subr.bf16.mxu1 %v911_v0 }
  0x70   :  { %653 = vmatpush3.bf16.msra.mxu0 %v737_v9  ;;  %673 = vmatpush3.bf16.msra.mxu1 %v745_v15 }
  0x71   :  { %654 = vmatprep.subr.bf16.mxu0 %v911_v0  ;;  %674 = vmatprep.subr.bf16.mxu1 %v911_v0 }
  0x74   :  { %655 = vmatpush3.bf16.msra.mxu0 %v738_v11  ;;  %675 = vmatpush3.bf16.msra.mxu1 %v746_v17 }
  0x75   :  { %656 = vmatprep.subr.bf16.mxu0 %v911_v0  ;;  %676 = vmatprep.subr.bf16.mxu1 %v911_v0 }
  0x78   :  { %657 = vmatpush3.bf16.msra.mxu0 %v739_v13  ;;  %677 = vmatpush3.bf16.msra.mxu1 %v747_v18 }
  0x79   :  { %682 = vmatprep.subr.bf16.mxu0 %v911_v0  ;;  %702 = vmatprep.subr.bf16.mxu1 %v911_v0 }
  0x7b   :  { %659 = vmatmul.mubr.bf16.vlgmr.msra.gmra.mrb[0].mxu0 %v101_v16 }
  0x7c   :  { %698 = vmatprep.mubr.msk.bf16.mxu0 %vm912_vm0, %v911_v0  ;;  %683 = vmatpush3.bf16.msra.mxu0 %v748_v19 }
  0x7d   :  { %684 = vmatprep.subr.bf16.mxu0 %v911_v0 }
  0x80   :  { %685 = vmatpush3.bf16.msra.mxu0 %v749_v20 }
  0x81   :  { %686 = vmatprep.subr.bf16.mxu0 %v911_v0 }
  0x84   :  { %687 = vmatpush3.bf16.msra.mxu0 %v750_v21 }
  0x85   :  { %688 = vmatprep.subr.bf16.mxu0 %v911_v0 }
  0x88   :  { %689 = vmatpush3.bf16.msra.mxu0 %v751_v22 }
  0x89   :  { %690 = vmatprep.subr.bf16.mxu0 %v911_v0 }
  0x8c   :  { %691 = vmatpush3.bf16.msra.mxu0 %v752_v23 }
  0x8d   :  { %692 = vmatprep.subr.bf16.mxu0 %v911_v0 }
  0x90   :  { %693 = vmatpush3.bf16.msra.mxu0 %v753_v24 }
  0x91   :  { %694 = vmatprep.subr.bf16.mxu0 %v911_v0 }
  0x94   :  { %695 = vmatpush3.bf16.msra.mxu0 %v754_v33 }
  0x95   :  { %696 = vmatprep.subr.bf16.mxu0 %v911_v0 }
  0x98   :  { %697 = vmatpush3.bf16.msra.mxu0 %v755_v34 }
 0x14e   :  { %v207_v26 = vpop.f32.mrb[0].mxu0 }
 0x14f   :  { %v208_v27 = vadd.f32 %v570_v25, %v207_v26  ;;  %v660_v28 = vpop.f32.mrb[1].mxu0 }
 0x150   :  { %v210_v29 = vpop.f32.mrb[2].mxu0 }
 0x151   :  { %v213_v30 = vmax.f32 %v208_v27, 0.0  ;;  %v661_v31 = vpop.f32.mrb[3].mxu0 }
 0x153   :  { %v214_v32 = vpack.c.bf16 %v213_v30, %v213_v30 }
 0x155   :  { %679 = vmatmul.mubr.bf16.vlgmr.msra.gmra.mrb[0].mxu1 %v214_v32 }
 0x156   :  { %718 = vmatprep.mubr.msk.bf16.mxu1 %vm912_vm0, %v911_v0  ;;  %703 = vmatpush3.bf16.msra.mxu1 %v756_v35 }
 0x157   :  { %704 = vmatprep.subr.bf16.mxu1 %v911_v0 }
 0x15a   :  { %705 = vmatpush3.bf16.msra.mxu1 %v757_v36 }
 0x15b   :  { %706 = vmatprep.subr.bf16.mxu1 %v911_v0 }
 0x15e   :  { %707 = vmatpush3.bf16.msra.mxu1 %v758_v37 }
 0x15f   :  { %708 = vmatprep.subr.bf16.mxu1 %v911_v0 }
 0x162   :  { %709 = vmatpush3.bf16.msra.mxu1 %v759_v38 }
 0x163   :  { %710 = vmatprep.subr.bf16.mxu1 %v911_v0 }
 0x166   :  { %711 = vmatpush3.bf16.msra.mxu1 %v760_v39 }
 0x167   :  { %712 = vmatprep.subr.bf16.mxu1 %v911_v0 }
 0x16a   :  { %713 = vmatpush3.bf16.msra.mxu1 %v761_v40 }
 0x16b   :  { %714 = vmatprep.subr.bf16.mxu1 %v911_v0 }
 0x16e   :  { %715 = vmatpush3.bf16.msra.mxu1 %v762_v49 }
 0x16f   :  { %716 = vmatprep.subr.bf16.mxu1 %v911_v0 }
 0x172   :  { %717 = vmatpush3.bf16.msra.mxu1 %v763_v50 }
 0x228   :  { %v320_v42 = vpop.f32.mrb[0].mxu1 }
 0x229   :  { %v321_v43 = vadd.f32 %v579_v41, %v320_v42  ;;  %v680_v44 = vpop.f32.mrb[1].mxu1 }
 0x22a   :  { %v323_v45 = vpop.f32.mrb[2].mxu1 }
 0x22b   :  { %v326_v46 = vmax.f32 %v321_v43, 0.0  ;;  %v681_v47 = vpop.f32.mrb[3].mxu1 }
 0x22d   :  { %v327_v48 = vpack.c.bf16 %v326_v46, %v326_v46 }
 0x22f   :  { %699 = vmatmul.mubr.bf16.vlgmr.msra.gmra.mrb[4].mxu0 %v327_v48 }
 0x302   :  { %v433_v52 = vpop.f32.mrb[4].mxu0 }
 0x303   :  { %v434_v53 = vadd.f32 %v588_v51, %v433_v52  ;;  %v700_v54 = vpop.f32.mrb[5].mxu0 }
 0x304   :  { %v436_v55 = vpop.f32.mrb[6].mxu0 }
 0x305   :  { %v439_v56 = vmax.f32 %v434_v53, 0.0  ;;  %v701_v57 = vpop.f32.mrb[7].mxu0 }
 0x307   :  { %v440_v58 = vpack.c.bf16 %v439_v56, %v439_v56 }
 0x309   :  { %719 = vmatmul.mubr.bf16.vlgmr.msra.gmra.mrb[4].mxu1 %v440_v58 }
 0x3dc   :  { %v546_v60 = vpop.f32.mrb[4].mxu1 }
 0x3dd   :  { %v547_v61 = vadd.f32 %v597_v59, %v546_v60  ;;  %v720_v62 = vpop.f32.mrb[5].mxu1 }
 0x3de   :  { %v549_v63 = vpop.f32.mrb[6].mxu1 }
 0x3df   :  { %552 = vst [vmem:[#allocation11] sm:$0xff] %v547_v61  ;;  %v721_v0 = vpop.f32.mrb[7].mxu1 }
 0x3e0   :  { %885 = shalt.err (!%p882_p2)
}
 0x3e1   :  { %s886_s8 = scalar_lea.hbm %s1109_s9, 128 }
 0x3e2   :  { %p887_p3 = scmp.ne.s32.totalorder %s1109_s9, %s886_s8  ;;  %p890_p4 = scmp.lt.u32.totalorder %s886_s8, %s1109_s9 }
 0x3e4   :  { %p892_p5 = pnand %p890_p4, %p887_p3 }
 0x3e6   :  { %895 = shalt.err (!%p892_p5)
}
 0x3e7   :  { %562 = dma.vmem_to_hbm [thread:$0]  %s560_s12, 128, %s1109_s9, [#allocation4]  }
 0x3e8   :  { %902 = dma.done.wait [#allocation4], 128  }
 0x3e9   :  { %903 = vsyncadd [#allocation4], 4294967168 }
 0x3ea   :  { %566 = vsyncpa [#allocation3], 1 }
 0x3eb   :  { %567 = vsyncpa [#allocation6], 1 }
 0x3ec   :  { %568 = vsyncpa [#allocation9], 1 }
 0x3ed   :  { %569 = vsyncpa [#allocation4], 1 }

</bundles_post_ra>
